<compile_context>
chip_gen: v6e
topology: v6e:2x2x1
jax: 0.10.0
libtpu: 0.0.40
codegen_flags: <defaults>
</compile_context>

<pallas_src>
import numpy as np
import jax
import jax.numpy as jnp
from jax.experimental import pallas as pl
from jax.experimental.pallas import tpu as pltpu  # noqa: F401  (TPU backend)


# ----------------------------- Pallas kernel ------------------------------ #
def make_fused_gcn_kernel(num_layers, leaf_start):
    """Kernel running all GCN layers (+ relu each) fully on-chip."""

    def kernel(*refs):
        a_ref, x_ref = refs[0], refs[1]
        wb_refs = refs[2:2 + 2 * num_layers]
        o_ref = refs[2 + 2 * num_layers]

        a = a_ref[...]                          # (N, N) bf16, resident for all layers
        h = x_ref[...]                          # (N, 1) f32 activation

        for i in range(num_layers):             # unrolled at trace time
            w = wb_refs[2 * i][...]             # (Fin, Fout) f32
            b = wb_refs[2 * i + 1][...]         # (1,  Fout) f32
            if h.shape[1] == 1:
                # Fin == 1:  A @ (h @ w) == (A @ h) * w  -> mat-vec + VPU multiply
                ax = jnp.dot(a, h.astype(jnp.bfloat16),
                             preferred_element_type=jnp.float32)        # (N, 1)
                out = ax * w + b                                        # (N, Fout)
            else:
                hw = jnp.dot(h.astype(jnp.bfloat16), w.astype(jnp.bfloat16),
                             preferred_element_type=jnp.float32)        # (N, Fout)
                out = jnp.dot(a, hw.astype(jnp.bfloat16),
                              preferred_element_type=jnp.float32) + b   # (N, Fout)
            h = jnp.maximum(out, 0.0)           # .relu() applied to every layer

        # Emit only the leaf rows (contiguous [leaf_start, N) for a complete tree);
        # slice is sublane-aligned (leaf_start multiple of 8) -> zero-cost view.
        o_ref[...] = h[leaf_start:, :].astype(o_ref.dtype)

    return kernel


# ------------------------------- Wrappers ---------------------------------- #
def build_normalized_adjacency(edge_index, num_nodes):
    """Dense GCN-normalized adjacency with self-loops (plain JAX glue)."""
    src = edge_index[0]
    dst = edge_index[1]
    a = jnp.zeros((num_nodes, num_nodes), jnp.float32)
    a = a.at[dst, src].add(1.0)                     # message: src -> dst
    a = a + jnp.eye(num_nodes, dtype=jnp.float32)   # self-loops
    deg = a.sum(axis=1)
    d_inv_sqrt = jnp.where(deg > 0, 1.0 / jnp.sqrt(deg), 0.0)
    return d_inv_sqrt[:, None] * a * d_inv_sqrt[None, :]


def init_params(key, dims):
    """Deterministic Glorot-uniform weights, zero biases (matches GCNConv init)."""
    params = []
    for f_in, f_out in zip(dims[:-1], dims[1:]):
        key, sub = jax.random.split(key)
        limit = float(np.sqrt(6.0 / (f_in + f_out)))
        w = jax.random.uniform(sub, (f_in, f_out), jnp.float32, -limit, limit)
        b = jnp.zeros((1, f_out), jnp.float32)
        params.append((w, b))
    return params


def neural_tree_forward(x, a_hat, params, leaf_start):
    """Fused forward: one pallas_call for all layers; returns leaf outputs."""
    n = a_hat.shape[0]
    num_layers = len(params)
    f_out_last = params[-1][0].shape[1]
    n_leaf = n - leaf_start

    x_hat = x.reshape(-1, 1).astype(jnp.float32)      # x.view(-1, 1)
    # TODO(synk): F.dropout (training-mode randomness) implemented as identity (eval).
    a_bf16 = a_hat.astype(jnp.bfloat16)               # bf16-native MXU, half DMA bytes

    operands = [a_bf16, x_hat]
    in_specs = [
        pl.BlockSpec((n, n), lambda: (0, 0)),
        pl.BlockSpec((n, 1), lambda: (0, 0)),
    ]
    for w, b in params:
        operands += [w, b]
        in_specs += [
            pl.BlockSpec(w.shape, lambda: (0, 0)),
            pl.BlockSpec(b.shape, lambda: (0, 0)),
        ]

    kernel = make_fused_gcn_kernel(num_layers, leaf_start)
    out = pl.pallas_call(
        kernel,
        out_shape=jax.ShapeDtypeStruct((n_leaf, f_out_last), jnp.float32),
        in_specs=in_specs,
        out_specs=pl.BlockSpec((n_leaf, f_out_last), lambda: (0, 0)),
    )(*operands)
    return jnp.squeeze(out, -1)


# ---------------------------------- Main ----------------------------------- #
if __name__ == "__main__":
    N = 64            # number of tree nodes
    HIDDEN = 32       # args.hidden_dim
    NUM_LAYERS = 3    # args.num_layers
    OUTPUT_DIM = 1    # args.output_dim (scalar -> no post_mp branch)

    # Complete binary tree over N nodes; undirected edges (both directions).
    src_list, dst_list = [], []
    for child in range(1, N):
        parent = (child - 1) // 2
        src_list += [child, parent]
        dst_list += [parent, child]
    edge_index = jnp.asarray(np.stack([src_list, dst_list]), dtype=jnp.int32)

    # Leaf mask: nodes with no children; for this tree it is the contiguous
    # range [N//2, N), which the kernel exploits as a static row slice.
    leaf_mask = np.array([2 * i + 1 >= N for i in range(N)], dtype=bool)
    leaf_start = int(np.argmax(leaf_mask))
    assert leaf_mask[leaf_start:].all() and not leaf_mask[:leaf_start].any()

    key = jax.random.PRNGKey(0)
    key, k_x = jax.random.split(key)
    x = jax.random.normal(k_x, (N, 1), jnp.float32)  # one scalar feature per node

    a_hat = build_normalized_adjacency(edge_index, N)
    dims = [1] + [HIDDEN] * (NUM_LAYERS - 1) + [OUTPUT_DIM]
    params = init_params(key, dims)

    out = neural_tree_forward(x, a_hat, params, leaf_start)
    jax.block_until_ready(out)

    assert out.shape == (int(leaf_mask.sum()),)
    print("KERNEL_OK")
</pallas_src>

<mosaic_0001>
module attributes {stable_mosaic.version = 11 : i64} {
  func.func @kernel(%arg0: memref<64x64xbf16, #tpu.memory_space<vmem>>, %arg1: memref<64x1xf32, #tpu.memory_space<vmem>>, %arg2: memref<1x32xf32, #tpu.memory_space<vmem>>, %arg3: memref<1x32xf32, #tpu.memory_space<vmem>>, %arg4: memref<32x32xf32, #tpu.memory_space<vmem>>, %arg5: memref<1x32xf32, #tpu.memory_space<vmem>>, %arg6: memref<32x1xf32, #tpu.memory_space<vmem>>, %arg7: memref<1x1xf32, #tpu.memory_space<vmem>>, %arg8: memref<32x1xf32, #tpu.memory_space<vmem>>) attributes {dimension_semantics = [], scalar_prefetch = 0 : i64, scratch_operands = 0 : i64, tpu.core_type = #tpu.core_type<tc>} {
    %c0 = arith.constant 0 : index
    %c0_0 = arith.constant 0 : index
    %0 = vector.load %arg0[%c0, %c0_0] : memref<64x64xbf16, #tpu.memory_space<vmem>>, vector<64x64xbf16>
    %c0_1 = arith.constant 0 : index
    %c0_2 = arith.constant 0 : index
    %1 = vector.load %arg1[%c0_1, %c0_2] : memref<64x1xf32, #tpu.memory_space<vmem>>, vector<64x1xf32>
    %c0_3 = arith.constant 0 : index
    %c0_4 = arith.constant 0 : index
    %2 = vector.load %arg2[%c0_3, %c0_4] : memref<1x32xf32, #tpu.memory_space<vmem>>, vector<1x32xf32>
    %c0_5 = arith.constant 0 : index
    %c0_6 = arith.constant 0 : index
    %3 = vector.load %arg3[%c0_5, %c0_6] : memref<1x32xf32, #tpu.memory_space<vmem>>, vector<1x32xf32>
    %4 = arith.truncf %1 : vector<64x1xf32> to vector<64x1xbf16>
    %cst = arith.constant dense<0.000000e+00> : vector<64x1xf32>
    %5 = tpu.matmul %0, %4, %cst {dimension_numbers = #tpu.dot_dimension_numbers<[1], [0], [0], [1], [0, 0, 1, 1], [], []>} : vector<64x64xbf16>, vector<64x1xbf16>, vector<64x1xf32> -> vector<64x1xf32>
    %6 = vector.broadcast %5 : vector<64x1xf32> to vector<64x32xf32>
    %7 = vector.broadcast %2 : vector<1x32xf32> to vector<64x32xf32>
    %8 = arith.mulf %6, %7 : vector<64x32xf32>
    %9 = vector.broadcast %3 : vector<1x32xf32> to vector<64x32xf32>
    %10 = arith.addf %8, %9 : vector<64x32xf32>
    %cst_7 = arith.constant 0.000000e+00 : f32
    %11 = vector.broadcast %cst_7 : f32 to vector<64x32xf32>
    %12 = arith.maximumf %10, %11 : vector<64x32xf32>
    %c0_8 = arith.constant 0 : index
    %c0_9 = arith.constant 0 : index
    %13 = vector.load %arg4[%c0_8, %c0_9] : memref<32x32xf32, #tpu.memory_space<vmem>>, vector<32x32xf32>
    %c0_10 = arith.constant 0 : index
    %c0_11 = arith.constant 0 : index
    %14 = vector.load %arg5[%c0_10, %c0_11] : memref<1x32xf32, #tpu.memory_space<vmem>>, vector<1x32xf32>
    %15 = arith.truncf %12 : vector<64x32xf32> to vector<64x32xbf16>
    %16 = arith.truncf %13 : vector<32x32xf32> to vector<32x32xbf16>
    %cst_12 = arith.constant dense<0.000000e+00> : vector<64x32xf32>
    %17 = tpu.matmul %15, %16, %cst_12 {dimension_numbers = #tpu.dot_dimension_numbers<[1], [0], [0], [1], [0, 0, 1, 1], [], []>} : vector<64x32xbf16>, vector<32x32xbf16>, vector<64x32xf32> -> vector<64x32xf32>
    %18 = arith.truncf %17 : vector<64x32xf32> to vector<64x32xbf16>
    %cst_13 = arith.constant dense<0.000000e+00> : vector<64x32xf32>
    %19 = tpu.matmul %0, %18, %cst_13 {dimension_numbers = #tpu.dot_dimension_numbers<[1], [0], [0], [1], [0, 0, 1, 1], [], []>} : vector<64x64xbf16>, vector<64x32xbf16>, vector<64x32xf32> -> vector<64x32xf32>
    %20 = vector.broadcast %14 : vector<1x32xf32> to vector<64x32xf32>
    %21 = arith.addf %19, %20 : vector<64x32xf32>
    %cst_14 = arith.constant 0.000000e+00 : f32
    %22 = vector.broadcast %cst_14 : f32 to vector<64x32xf32>
    %23 = arith.maximumf %21, %22 : vector<64x32xf32>
    %c0_15 = arith.constant 0 : index
    %c0_16 = arith.constant 0 : index
    %24 = vector.load %arg6[%c0_15, %c0_16] : memref<32x1xf32, #tpu.memory_space<vmem>>, vector<32x1xf32>
    %c0_17 = arith.constant 0 : index
    %c0_18 = arith.constant 0 : index
    %25 = vector.load %arg7[%c0_17, %c0_18] : memref<1x1xf32, #tpu.memory_space<vmem>>, vector<1x1xf32>
    %26 = arith.truncf %23 : vector<64x32xf32> to vector<64x32xbf16>
    %27 = arith.truncf %24 : vector<32x1xf32> to vector<32x1xbf16>
    %cst_19 = arith.constant dense<0.000000e+00> : vector<64x1xf32>
    %28 = tpu.matmul %26, %27, %cst_19 {dimension_numbers = #tpu.dot_dimension_numbers<[1], [0], [0], [1], [0, 0, 1, 1], [], []>} : vector<64x32xbf16>, vector<32x1xbf16>, vector<64x1xf32> -> vector<64x1xf32>
    %29 = arith.truncf %28 : vector<64x1xf32> to vector<64x1xbf16>
    %cst_20 = arith.constant dense<0.000000e+00> : vector<64x1xf32>
    %30 = tpu.matmul %0, %29, %cst_20 {dimension_numbers = #tpu.dot_dimension_numbers<[1], [0], [0], [1], [0, 0, 1, 1], [], []>} : vector<64x64xbf16>, vector<64x1xbf16>, vector<64x1xf32> -> vector<64x1xf32>
    %31 = vector.broadcast %25 : vector<1x1xf32> to vector<64x1xf32>
    %32 = arith.addf %30, %31 : vector<64x1xf32>
    %cst_21 = arith.constant 0.000000e+00 : f32
    %33 = vector.broadcast %cst_21 : f32 to vector<64x1xf32>
    %34 = arith.maximumf %32, %33 : vector<64x1xf32>
    %35 = vector.extract_strided_slice %34 {offsets = [32, 0], sizes = [32, 1], strides = [1, 1]} : vector<64x1xf32> to vector<32x1xf32>
    %c0_22 = arith.constant 0 : index
    %c0_23 = arith.constant 0 : index
    %36 = vector.load %arg8[%c0_22, %c0_23] : memref<32x1xf32, #tpu.memory_space<vmem>>, vector<32x1xf32>
    tpu.vector_store %arg8[%c0_22, %c0_23], %35 {strides = array<i32>} : memref<32x1xf32, #tpu.memory_space<vmem>>, vector<32x1xf32>,
    return
  }
}

</mosaic_0001>

<bundles_post_ra>
// kernel: tpu_custom_call.1
= control target key start
LH: loop header
LB: loop body
LE: loop exit
PB: predicated region body
PF: predicated region fallthrough
CT: control target
= control target key end

     0   :  { %v715_v3 = vmov 0   ;;  %vm74_vm0 = vcmask 523264   ;;  %vm239_vm1 = vcmask 261120   ;;  %vm563_vm2 = vcmask 7168   ;;  %s885_s1 = inlined_call_operand.vmem [shape: f32[64,1], index: 1, kind: input, shape index: {}]   ;;  %s886_s0 = inlined_call_operand.vmem [shape: bf16[64,64], index: 0, kind: input, shape index: {}]   ;;  %s887_s4 = inlined_call_operand.vmem [shape: f32[32,32], index: 4, kind: input, shape index: {}]   ;;  %s888_s2 = inlined_call_operand.vmem [shape: f32[1,32], index: 2, kind: input, shape index: {}]   ;;  %s889_s3 = inlined_call_operand.vmem [shape: f32[1,32], index: 3, kind: input, shape index: {}]   ;;  %s890_s6 = inlined_call_operand.vmem [shape: f32[32,1], index: 6, kind: input, shape index: {}]   ;;  %s891_s5 = inlined_call_operand.vmem [shape: f32[1,32], index: 5, kind: input, shape index: {}]   ;;  %s892_s7 = inlined_call_operand.<no memory space> [shape: f32[1,1], index: 7, kind: input, shape index: {}]   ;;  %s893_s8 = inlined_call_operand.vmem [shape: f32[32,1], index: 8, kind: output, shape index: {}]  }
   0x1   :  { %v46_v0 = vld [vmem:[%s885_s1 + $0x30] sm:$0xff]  ;;  %v47_v1 = vld [vmem:[%s885_s1 + $0x38] sm:$0xff]  ;;  %v44_v2 = vld [vmem:[%s885_s1 + $0x20] sm:$0xff]  ;;  %710 = vset.pattern.permute.xlu1 %v715_v3  ;;  %709 = vset.pattern.permute.xlu0 %v715_v3 }
   0x2   :  { %v53_v4 = vpack.c.bf16 %v47_v1, %v46_v0  ;;  %v45_v5 = vld [vmem:[%s885_s1 + $0x28] sm:$0xff]  ;;  %v42_v7 = vld [vmem:[%s885_s1 + $0x10] sm:$0xff]  ;;  %v43_v8 = vld [vmem:[%s885_s1 + $0x18] sm:$0xff] }
   0x3   :  { %v52_v6 = vpack.c.bf16 %v45_v5, %v44_v2  ;;  %v782_v9 = vld [vmem:[%s886_s0] sm:$0xff]   ;;  %v51_v10 = vpack.c.bf16 %v43_v8, %v42_v7  ;;  %v41_v12 = vld [vmem:[%s885_s1 + $0x8] sm:$0xff]  ;;  %v800_v15 = vld [vmem:[%s886_s0 + $0x10] sm:$0xff]  }
   0x4   :  { %636 = vmatprep.subr.bf16.mxu0 %v53_v4  ;;  %644 = vmatprep.mubr.msk.bf16.mxu0 %vm74_vm0, %v782_v9  ;;  %v40_v11 = vld [vmem:[%s885_s1] sm:$0xff]  ;;  %v795_v14 = vld [vmem:[%s886_s0 + $0x8] sm:$0xff]   ;;  %v809_v16 = vld [vmem:[%s886_s0 + $0x18] sm:$0xff]  }
   0x5   :  { %637 = vmatpush3.bf16.msra.mxu0 %v53_v4  ;;  %v50_v13 = vpack.c.bf16 %v41_v12, %v40_v11  ;;  %v230_v18 = vld [vmem:[%s887_s4 + $0x10] sm:$0xff]  ;;  %v231_v19 = vld [vmem:[%s887_s4 + $0x18] sm:$0xff]  ;;  %v228_v23 = vld [vmem:[%s887_s4] sm:$0xff] }
   0x6   :  { %638 = vmatprep.subr.bf16.mxu0 %v52_v6  ;;  %v238_v21 = vpack.c.bf16 %v231_v19, %v230_v18  ;;  %v229_v24 = vld [vmem:[%s887_s4 + $0x8] sm:$0xff]  ;;  %v580_v32 = vld [vmem:[%s888_s2] ss:$0 sm:$0xff]  ;;  %v402_v5 = vld [vmem:[%s890_s6 + $0x10] sm:$0xff] }
   0x7   :  { %v237_v26 = vpack.c.bf16 %v229_v24, %v228_v23  ;;  %v581_v37 = vld [vmem:[%s889_s3] ss:$0 sm:$0xff] }
   0x8   :  { %652 = vmatprep.subr.bf16.mxu1 %v238_v21  ;;  %v400_v24 = vld [vmem:[%s890_s6] sm:$0xff] }
   0x9   :  { %639 = vmatpush3.bf16.msra.mxu0 %v52_v6  ;;  %653 = vmatpush3.bf16.msra.mxu1 %v238_v21  ;;  %v403_v6 = vld [vmem:[%s890_s6 + $0x18] sm:$0xff] }
   0xa   :  { %640 = vmatprep.subr.bf16.mxu0 %v51_v10  ;;  %654 = vmatprep.subr.bf16.mxu1 %v237_v26  ;;  %v410_v7 = vpack.c.bf16 %v403_v6, %v402_v5 }
   0xd   :  { %641 = vmatpush3.bf16.msra.mxu0 %v51_v10  ;;  %655 = vmatpush3.bf16.msra.mxu1 %v237_v26 }
   0xe   :  { %642 = vmatprep.subr.bf16.mxu0 %v50_v13 }
  0x11   :  { %643 = vmatpush3.bf16.msra.mxu0 %v50_v13 }
  0x12   :  { %680 = vmatprep.subr.bf16.mxu0 %v410_v7 }
  0x14   :  { %645 = vmatmul.mubr.msk.bf16.vlgmr.msra.gmra.mxu0 %vm74_vm0, %v795_v14 }
  0x15   :  { %648 = vmatprep.mubr.msk.bf16.mxu0 %vm74_vm0, %v800_v15  ;;  %681 = vmatpush3.bf16.msra.mxu0 %v410_v7 }
  0x1c   :  { %649 = vmatmul.mubr.msk.bf16.gmra.mxu0 %vm74_vm0, %v809_v16 }
  0xd4   :  { %v646_v17 = vpop.f32.mrf.mxu0 }
  0xd5   :  { %164 = vperm.xlu1 %710, %v646_v17  }
  0xd6   :  { %v121_v20 = vpop.f32.mrf.mxu0 }
  0xd7   :  { %154 = vperm.xlu0 %709, %v121_v20  }
  0xd8   :  { %v647_v22 = vpop.f32.mrf.mxu0 }
  0xd9   :  { %169 = vperm.xlu1 %710, %v647_v22  }
  0xda   :  { %v124_v25 = vpop.f32.mrf.mxu0 }
  0xdb   :  { %159 = vperm.xlu0 %709, %v124_v25   ;;  %v401_v25 = vld [vmem:[%s890_s6 + $0x8] sm:$0xff] }
  0xdc   :  { %v650_v27 = vpop.f32.mrf.mxu0  ;;  %v409_v26 = vpack.c.bf16 %v401_v25, %v400_v24 }
  0xde   :  { %v137_v28 = vpop.f32.mrf.mxu0  ;;  %682 = vmatprep.subr.bf16.mxu0 %v409_v26 }
  0xdf   :  { %174 = vperm.xlu0 %709, %v137_v28   ;;  %683 = vmatpush3.bf16.msra.mxu0 %v409_v26 }
  0xe0   :  { %v651_v29 = vpop.f32.mrf.mxu0 }
  0xe2   :  { %v140_v30 = vpop.f32.mrf.mxu0 }
  0xe3   :  { %184 = vperm.xlu0 %709, %v650_v27   ;;  %179 = vperm.xlu1 %710, %v140_v30  }
  0xe7   :  { %189 = vperm.xlu1 %710, %v651_v29   ;;  %v586_v29 = vld [vmem:[%s891_s5] ss:$0 sm:$0xff] }
 0x150   :  { %v165_v31 = vpop.permute.xlu1 %164 }
 0x151   :  { %v200_v35 = vmul.f32 %v580_v32, %v165_v31 }
 0x152   :  { %v155_v33 = vpop.permute.xlu0 %154 }
 0x153   :  { %v198_v34 = vmul.f32 %v580_v32, %v155_v33  ;;  %v214_v43 = vadd.f32 %v581_v37, %v200_v35 }
 0x154   :  { %v170_v36 = vpop.permute.xlu1 %169 }
 0x155   :  { %v201_v38 = vmul.f32 %v580_v32, %v170_v36  ;;  %v212_v40 = vadd.f32 %v581_v37, %v198_v34  ;;  %v222_v50 = vmax.f32 %v214_v43, 0.0 }
 0x156   :  { %v160_v39 = vpop.permute.xlu0 %159 }
 0x157   :  { %v215_v41 = vadd.f32 %v581_v37, %v201_v38  ;;  %v199_v42 = vmul.f32 %v580_v32, %v160_v39  ;;  %v220_v47 = vmax.f32 %v212_v40, 0.0 }
 0x159   :  { %v213_v44 = vadd.f32 %v581_v37, %v199_v42  ;;  %v223_v45 = vmax.f32 %v215_v41, 0.0 }
 0x15a   :  { %v175_v46 = vpop.permute.xlu0 %174 }
 0x15b   :  { %v221_v48 = vmax.f32 %v213_v44, 0.0  ;;  %v202_v49 = vmul.f32 %v580_v32, %v175_v46  ;;  %v234_v52 = vpack.c.bf16 %v223_v45, %v222_v50 }
 0x15d   :  { %v233_v51 = vpack.c.bf16 %v221_v48, %v220_v47  ;;  %v216_v55 = vadd.f32 %v581_v37, %v202_v49 }
 0x15e   :  { %v185_v53 = vpop.permute.xlu0 %184  ;;  %v180_v54 = vpop.permute.xlu1 %179 }
 0x15f   :  { %v204_v56 = vmul.f32 %v580_v32, %v185_v53  ;;  %v203_v57 = vmul.f32 %v580_v32, %v180_v54  ;;  %656 = vmatprep.mubr.msk.bf16.mxu1 %vm239_vm1, %v233_v51  ;;  %v224_v60 = vmax.f32 %v216_v55, 0.0 }
 0x160   :  { %657 = vmatmul.mubr.msk.bf16.vlgmr.msra.gmra.mxu1 %vm239_vm1, %v234_v52 }
 0x161   :  { %v217_v58 = vadd.f32 %v581_v37, %v203_v57  ;;  %v218_v61 = vadd.f32 %v581_v37, %v204_v56 }
 0x162   :  { %v190_v59 = vpop.permute.xlu1 %189 }
 0x163   :  { %v225_v62 = vmax.f32 %v217_v58, 0.0  ;;  %v205_v63 = vmul.f32 %v580_v32, %v190_v59  ;;  %v226_v2 = vmax.f32 %v218_v61, 0.0 }
 0x165   :  { %v235_v0 = vpack.c.bf16 %v225_v62, %v224_v60  ;;  %v219_v1 = vadd.f32 %v581_v37, %v205_v63 }
 0x167   :  { %v227_v3 = vmax.f32 %v219_v1, 0.0  ;;  %660 = vmatprep.mubr.msk.bf16.mxu1 %vm239_vm1, %v235_v0 }
 0x169   :  { %v236_v4 = vpack.c.bf16 %v227_v3, %v226_v2  ;;  %v13_v3 = vstv %s892_s7 }
 0x16a   :  { %14 = vst [vmem:[#allocation2] sm:$0x1] %v13_v3 }
 0x16b   :  { %661 = vmatmul.mubr.msk.bf16.gmra.mxu1 %vm239_vm1, %v236_v4 }
 0x16c   :  { %672 = vmatprep.mubr.msk.bf16.mxu1 %vm74_vm0, %v782_v9 }
 0x220   :  { %v658_v8 = vpop.f32.mrf.mxu1 }
 0x222   :  { %v286_v10 = vpop.f32.mrf.mxu1 }
 0x224   :  { %v659_v11 = vpop.f32.mrf.mxu1 }
 0x225   :  { %v318_v22 = vpack.c.bf16 %v659_v11, %v658_v8  ;;  %v595_v8 = vld [vmem:[#allocation2] ss:$0 sm:$0xff] }
 0x226   :  { %v289_v12 = vpop.f32.mrf.mxu1 }
 0x227   :  { %v317_v23 = vpack.c.bf16 %v289_v12, %v286_v10 }
 0x22b   :  { %v662_v13 = vpop.f32.mrf.mxu1 }
 0x22d   :  { %v302_v17 = vpop.f32.mrf.mxu1 }
 0x22f   :  { %v663_v18 = vpop.f32.mrf.mxu1 }
 0x230   :  { %v320_v19 = vpack.c.bf16 %v663_v18, %v662_v13 }
 0x231   :  { %v305_v20 = vpop.f32.mrf.mxu1 }
 0x232   :  { %v319_v21 = vpack.c.bf16 %v305_v20, %v302_v17  ;;  %664 = vmatprep.subr.bf16.mxu1 %v320_v19 }
 0x233   :  { %665 = vmatpush3.bf16.msra.mxu1 %v320_v19 }
 0x234   :  { %666 = vmatprep.subr.bf16.mxu1 %v319_v21 }
 0x237   :  { %667 = vmatpush3.bf16.msra.mxu1 %v319_v21 }
 0x238   :  { %668 = vmatprep.subr.bf16.mxu1 %v318_v22 }
 0x23b   :  { %669 = vmatpush3.bf16.msra.mxu1 %v318_v22 }
 0x23c   :  { %670 = vmatprep.subr.bf16.mxu1 %v317_v23 }
 0x23f   :  { %671 = vmatpush3.bf16.msra.mxu1 %v317_v23 }
 0x242   :  { %673 = vmatmul.mubr.msk.bf16.vlgmr.msra.gmra.mxu1 %vm74_vm0, %v795_v14 }
 0x243   :  { %676 = vmatprep.mubr.msk.bf16.mxu1 %vm74_vm0, %v800_v15 }
 0x24a   :  { %677 = vmatmul.mubr.msk.bf16.gmra.mxu1 %vm74_vm0, %v809_v16 }
 0x24b   :  { %700 = vmatprep.mubr.msk.bf16.mxu1 %vm74_vm0, %v782_v9 }
 0x302   :  { %v674_v27 = vpop.f32.mrf.mxu1 }
 0x303   :  { %v370_v32 = vadd.f32 %v674_v27, %v586_v29 }
 0x304   :  { %v361_v28 = vpop.f32.mrf.mxu1 }
 0x305   :  { %v362_v31 = vadd.f32 %v586_v29, %v361_v28  ;;  %v394_v39 = vmax.f32 %v370_v32, 0.0 }
 0x306   :  { %v675_v30 = vpop.f32.mrf.mxu1 }
 0x307   :  { %v373_v9 = vadd.f32 %v675_v30, %v586_v29  ;;  %v392_v37 = vmax.f32 %v362_v31, 0.0 }
 0x308   :  { %v364_v33 = vpop.f32.mrf.mxu1 }
 0x309   :  { %v365_v34 = vadd.f32 %v586_v29, %v364_v33  ;;  %v395_v35 = vmax.f32 %v373_v9, 0.0 }
 0x30a   :  { %v678_v36 = vpop.f32.mrf.mxu1 }
 0x30b   :  { %v393_v38 = vmax.f32 %v365_v34, 0.0  ;;  %v406_v42 = vpack.c.bf16 %v395_v35, %v394_v39  ;;  %v386_v46 = vadd.f32 %v678_v36, %v586_v29 }
 0x30c   :  { %v377_v40 = vpop.f32.mrf.mxu1 }
 0x30d   :  { %v405_v41 = vpack.c.bf16 %v393_v38, %v392_v37  ;;  %v378_v44 = vadd.f32 %v586_v29, %v377_v40  ;;  %v398_v52 = vmax.f32 %v386_v46, 0.0 }
 0x30e   :  { %v679_v43 = vpop.f32.mrf.mxu1 }
 0x30f   :  { %v389_v45 = vadd.f32 %v679_v43, %v586_v29  ;;  %684 = vmatprep.mubr.msk.bf16.mxu0 %vm239_vm1, %v405_v41  ;;  %v396_v50 = vmax.f32 %v378_v44, 0.0 }
 0x310   :  { %v380_v47 = vpop.f32.mrf.mxu1  ;;  %685 = vmatmul.mubr.msk.bf16.vlgmr.msra.gmra.mxu0 %vm239_vm1, %v406_v42 }
 0x311   :  { %v381_v48 = vadd.f32 %v586_v29, %v380_v47  ;;  %v399_v49 = vmax.f32 %v389_v45, 0.0 }
 0x313   :  { %v397_v51 = vmax.f32 %v381_v48, 0.0  ;;  %v408_v54 = vpack.c.bf16 %v399_v49, %v398_v52 }
 0x315   :  { %v407_v53 = vpack.c.bf16 %v397_v51, %v396_v50 }
 0x317   :  { %688 = vmatprep.mubr.msk.bf16.mxu0 %vm239_vm1, %v407_v53 }
 0x318   :  { %689 = vmatmul.mubr.msk.bf16.gmra.mxu0 %vm239_vm1, %v408_v54 }
 0x3d0   :  { %v686_v55 = vpop.f32.mrf.mxu0 }
 0x3d2   :  { %v457_v56 = vpop.f32.mrf.mxu0 }
 0x3d4   :  { %v687_v57 = vpop.f32.mrf.mxu0 }
 0x3d5   :  { %v489_v1 = vpack.c.bf16 %v687_v57, %v686_v55 }
 0x3d6   :  { %v460_v58 = vpop.f32.mrf.mxu0 }
 0x3d7   :  { %v488_v2 = vpack.c.bf16 %v460_v58, %v457_v56 }
 0x3d8   :  { %v690_v59 = vpop.f32.mrf.mxu0 }
 0x3da   :  { %v473_v60 = vpop.f32.mrf.mxu0 }
 0x3dc   :  { %v691_v61 = vpop.f32.mrf.mxu0 }
 0x3dd   :  { %v491_v62 = vpack.c.bf16 %v691_v61, %v690_v59 }
 0x3de   :  { %v476_v63 = vpop.f32.mrf.mxu0 }
 0x3df   :  { %v490_v0 = vpack.c.bf16 %v476_v63, %v473_v60  ;;  %692 = vmatprep.subr.bf16.mxu1 %v491_v62 }
 0x3e0   :  { %693 = vmatpush3.bf16.msra.mxu1 %v491_v62 }
 0x3e1   :  { %694 = vmatprep.subr.bf16.mxu1 %v490_v0 }
 0x3e4   :  { %695 = vmatpush3.bf16.msra.mxu1 %v490_v0 }
 0x3e5   :  { %696 = vmatprep.subr.bf16.mxu1 %v489_v1 }
 0x3e8   :  { %697 = vmatpush3.bf16.msra.mxu1 %v489_v1 }
 0x3e9   :  { %698 = vmatprep.subr.bf16.mxu1 %v488_v2 }
 0x3ec   :  { %699 = vmatpush3.bf16.msra.mxu1 %v488_v2 }
 0x3ef   :  { %701 = vmatmul.mubr.msk.bf16.vlgmr.msra.gmra.mxu1 %vm74_vm0, %v795_v14 }
 0x3f0   :  { %704 = vmatprep.mubr.msk.bf16.mxu1 %vm74_vm0, %v800_v15 }
 0x3f7   :  { %705 = vmatmul.mubr.msk.bf16.gmra.mxu1 %vm74_vm0, %v809_v16 }
 0x4af   :  { %v702_v4 = vpop.f32.mrf.mxu1 }
 0x4b1   :  { %v532_v5 = vpop.f32.mrf.mxu1 }
 0x4b3   :  { %v703_v6 = vpop.f32.mrf.mxu1 }
 0x4b5   :  { %v534_v7 = vpop.f32.mrf.mxu1 }
 0x4b7   :  { %v706_v10 = vpop.f32.mrf.mxu1 }
 0x4b8   :  { %v553_v11 = vadd.f32 %v706_v10, %v595_v8 }
 0x4b9   :  { %v544_v14 = vpop.f32.mrf.mxu1 }
 0x4ba   :  { %v561_v12 = vmax.f32 %v553_v11, 0.0  ;;  %v545_v13 = vadd.f32 %v595_v8, %v544_v14 }
 0x4bb   :  { %v707_v15 = vpop.f32.mrf.mxu1 }
 0x4bc   :  { %566 = vst.msk [vmem:[%s893_s8 + $0x10] sm:$0xff] %vm563_vm2, %v561_v12  ;;  %v559_v16 = vmax.f32 %v545_v13, 0.0  ;;  %v556_v17 = vadd.f32 %v707_v15, %v595_v8 }
 0x4bd   :  { %v547_v18 = vpop.f32.mrf.mxu1 }
 0x4be   :  { %564 = vst.msk [vmem:[%s893_s8] sm:$0xff] %vm563_vm2, %v559_v16  ;;  %v562_v19 = vmax.f32 %v556_v17, 0.0  ;;  %v548_v20 = vadd.f32 %v595_v8, %v547_v18 }
 0x4c0   :  { %567 = vst.msk [vmem:[%s893_s8 + $0x18] sm:$0xff] %vm563_vm2, %v562_v19  ;;  %v560_v21 = vmax.f32 %v548_v20, 0.0 }
 0x4c2   :  { %565 = vst.msk [vmem:[%s893_s8 + $0x8] sm:$0xff] %vm563_vm2, %v560_v21 }

</bundles_post_ra>
